<compile_context>
chip_gen: v7x
topology: tpu7x:2x2x1
jax: 0.10.0
libtpu: 0.0.40
codegen_flags: <defaults>
</compile_context>

<pallas_src>
import functools
import math

import jax
import jax.numpy as jnp
from jax import lax
from jax.experimental import pallas as pl
from jax.experimental.pallas import tpu as pltpu


# --------------------------------------------------------------------------
# Pallas kernels
# --------------------------------------------------------------------------

def _sasa_logits_kernel(x_ref, wq_ref, wkflat_ref, sel_ref, mask_ref, att_ref,
                        stack_ref, *, K, Ca, kw, Wp, Lt, q_pos):
    """Phase 1: accumulate (M, K) attention logits over L-tiles; softmax at the end.

    x_ref      : (Ca, Lh)    haloed, flattened, channels-first tile of the padded
                             image (spatial on lanes; last channel is constant 1).
    wq_ref     : (M, Ca)     query projection (aug column is 0).
    wkflat_ref : (M, K*Ca)   key projection replicated per patch position, with the
                             relative-position embedding folded into the aug column.
    sel_ref    : (K*Ca, K)   0/1 selector summing each Ca-wide lane group to 1 logit.
    mask_ref   : (1, Lt)     1.0 at valid output positions, 0.0 at wrap/pad junk.
    att_ref    : (M, K)      resident output block; accumulates logits over the t
                             grid axis and holds softmax(logits) at the end.
    stack_ref  : (K*Ca, Lt)  scratch holding all K shifted windows, stacked.
    """
    t = pl.program_id(1)

    @pl.when(t == 0)
    def _init():
        att_ref[...] = jnp.zeros_like(att_ref)

    # Gather the K shifted windows into one lane-dense (K*Ca, Lt) operand.
    for p in range(K):
        s = (p // kw) * Wp + (p % kw)
        stack_ref[p * Ca:(p + 1) * Ca, :] = x_ref[:, s:s + Lt]

    # q projection of the q_pos-th window, kept (M, Lt): spatial dim on lanes.
    q = jnp.dot(wq_ref[...], stack_ref[q_pos * Ca:(q_pos + 1) * Ca, :],
                preferred_element_type=jnp.float32)                     # (M, Lt)
    q = q * mask_ref[...]                    # zero wrapped / padded columns & rows
    qc = q.astype(x_ref.dtype)

    # One deep MXU contraction over the spatial dim for all K positions at once.
    G = lax.dot_general(qc, stack_ref[...], (((1,), (1,)), ((), ())),
                        preferred_element_type=jnp.float32)             # (M, K*Ca)
    # Fold wk (+ rel-pos embedding carried by the aug channel), then reduce each
    # Ca-lane group to a single logit with a tiny 0/1-selector matmul.
    GW = G * wkflat_ref[...]
    att_ref[...] += jnp.dot(GW, sel_ref[...],
                            preferred_element_type=jnp.float32)         # (M, K)

    @pl.when(t == pl.num_programs(1) - 1)
    def _finalize():
        lg = att_ref[...]
        e = jnp.exp(lg - jnp.max(lg, axis=1, keepdims=True))
        att_ref[...] = e / jnp.sum(e, axis=1, keepdims=True)            # exact softmax


def _sasa_apply_kernel(x_ref, w2_ref, o_ref, stack_ref, *, K, Ca, kw, Wp, Lt):
    """Phase 2: out = W2 @ stacked_windows with W2[m, p*Ca+c] = att[m,p]*wv[m,c].

    A single fused MXU matmul (contraction depth K*Ca) producing a lane-dense
    (M, Lt) output tile written exactly once (no o_ref read-modify-write).
    """
    for p in range(K):
        s = (p // kw) * Wp + (p % kw)
        stack_ref[p * Ca:(p + 1) * Ca, :] = x_ref[:, s:s + Lt]
    w2 = w2_ref[...].astype(x_ref.dtype)                                 # (M, K*Ca)
    o_ref[...] = jnp.dot(w2, stack_ref[...],
                         preferred_element_type=jnp.float32)             # (M, Lt)


# --------------------------------------------------------------------------
# Wrapper
# --------------------------------------------------------------------------

@functools.partial(jax.jit, static_argnames=("kernel_size", "padding", "stride",
                                             "compute_dtype", "max_rows_per_tile"))
def sasa2d_pallas(x, wq, wk, wv, row_table, col_table, row_idx, col_idx,
                  kernel_size=(3, 3), padding=(1, 1), stride=(1, 1),
                  compute_dtype=jnp.bfloat16, max_rows_per_tile=None):
    B, C, H, W = x.shape
    M = wq.shape[0]
    kh, kw = kernel_size
    ph, pw = padding
    sh, sw = stride
    assert (sh, sw) == (1, 1)  # TODO(synk): strided windows not implemented
    K = kh * kw
    q_pos = math.ceil(K / 2)                  # faithful to the PyTorch module
    Hp, Wp = H + 2 * ph, W + 2 * pw
    Ho, Wo = Hp - kh + 1, Wp - kw + 1
    # The module reshapes its flat output to (H//s, W//s); valid for 'same' padding.
    assert Ho * Wo == (H // sh) * (W // sw)

    f32 = jnp.float32
    Ca = C + 1
    KCa = K * Ca
    itemsize = jnp.dtype(compute_dtype).itemsize
    sub_c = 16 if itemsize == 2 else 8        # sublane granule of compute_dtype

    def _rup(v, m):
        return -(-v // m) * m

    # ---- generation-aware VMEM budget (128 MiB on v5e/v6e, 64 MiB on v7x) ----
    try:
        cap_bytes = int(getattr(pltpu.get_tpu_info(), "vmem_capacity_bytes",
                                64 * 2 ** 20))
    except Exception:
        cap_bytes = 64 * 2 ** 20              # conservative (v7x-sized) fallback
    hw_limit = cap_bytes - 8 * 2 ** 20        # leave headroom for Mosaic internals
    budget = min((3 * cap_bytes) // 4, hw_limit - 8 * 2 ** 20)

    def _vmem_est(th):
        """Layout-aware VMEM estimate: sublane/lane padding + explicit buffer counts."""
        lt = _rup(th * Wp, 128)
        lh = lt + (kh - 1) * Wp + (kw - 1)
        x_blk = _rup(Ca, sub_c) * _rup(lh, 128) * itemsize       # haloed x tile
        stack = _rup(KCa, sub_c) * lt * itemsize                 # stacked windows scratch
        mlt32 = _rup(M, 8) * lt * 4                              # (M, Lt) f32 work / out
        mask_blk = 8 * lt * 4
        w_small = _rup(M, 8) * (_rup(KCa, 128) * 3 + 8 * 128) * 4
        return (2 * x_blk                     # double-buffered input block
                + 2 * mask_blk
                + 2 * stack                   # scratch + slicing temporaries
                + 4 * mlt32                   # q / cast / matmul result / out block x2
                + w_small)

    cap_rows = Ho if max_rows_per_tile is None else min(Ho, int(max_rows_per_tile))
    Th = 1
    for d in range(1, cap_rows + 1):
        if _vmem_est(d) <= budget:
            Th = d
    nT = -(-Ho // Th)
    Th = -(-Ho // nT)                         # rebalance: last tile isn't mostly padding
    nT = -(-Ho // Th)
    Lt = _rup(Th * Wp, 128)                   # lane-dense working width (mult. of 128)
    Lh = Lt + (kh - 1) * Wp + (kw - 1)        # haloed flat tile length
    vmem_limit = int(min(hw_limit, max(32 * 2 ** 20, 2 * _vmem_est(Th))))

    # ---- host prep (all in compute_dtype): pad + ones channel + haloed tiles ----
    xc = x.astype(compute_dtype)
    xp = jnp.pad(xc, ((0, 0), (0, 0), (ph, ph), (pw, pw)))              # (B, C, Hp, Wp)
    x_aug = jnp.concatenate(
        [xp.reshape(B, C, Hp * Wp),
         jnp.ones((B, 1, Hp * Wp), compute_dtype)], axis=1)             # (B, Ca, Hp*Wp)
    need = (nT - 1) * Th * Wp + Lh
    x_aug = jnp.pad(x_aug, ((0, 0), (0, 0), (0, max(0, need - Hp * Wp))))
    x_tiles = jnp.stack([x_aug[:, :, t * Th * Wp: t * Th * Wp + Lh]
                         for t in range(nT)], axis=1)                   # (B, nT, Ca, Lh)

    emb = jnp.concatenate([row_table[row_idx], col_table[col_idx]],
                          axis=1).astype(f32)                           # (K, M)
    wq_aug = jnp.concatenate([wq.astype(f32), jnp.zeros((M, 1), f32)],
                             axis=1).astype(compute_dtype)              # (M, Ca)
    wk_b = jnp.broadcast_to(wk.astype(f32)[:, None, :], (M, K, C))
    wkflat = jnp.concatenate([wk_b, emb.T[:, :, None]],
                             axis=2).reshape(M, KCa)                    # (M, K*Ca) f32
    wv_aug = jnp.concatenate([wv.astype(f32), jnp.zeros((M, 1), f32)], axis=1)  # (M, Ca)
    sel = (jnp.arange(KCa, dtype=jnp.int32)[:, None] // Ca
           == jnp.arange(K, dtype=jnp.int32)[None, :]).astype(f32)      # (K*Ca, K)

    lidx = jnp.arange(Lt, dtype=jnp.int32)
    rows = jnp.arange(nT, dtype=jnp.int32)[:, None] * Th + (lidx // Wp)[None, :]
    mask = ((lidx[None, :] % Wp < Wo)
            & (lidx[None, :] < Th * Wp)
            & (rows < Ho)).astype(f32).reshape(nT, 1, Lt)               # per-tile mask

    # ---- phase 1: per-(channel, patch-position) attention, shared over L ----
    att = pl.pallas_call(
        functools.partial(_sasa_logits_kernel, K=K, Ca=Ca, kw=kw, Wp=Wp, Lt=Lt,
                          q_pos=q_pos),
        out_shape=jax.ShapeDtypeStruct((B, M, K), f32),
        grid=(B, nT),
        in_specs=[
            pl.BlockSpec((None, None, Ca, Lh), lambda b, t: (b, t, 0, 0)),
            pl.BlockSpec((M, Ca), lambda b, t: (0, 0)),
            pl.BlockSpec((M, KCa), lambda b, t: (0, 0)),
            pl.BlockSpec((KCa, K), lambda b, t: (0, 0)),
            pl.BlockSpec((None, 1, Lt), lambda b, t: (t, 0, 0)),
        ],
        out_specs=pl.BlockSpec((None, M, K), lambda b, t: (b, 0, 0)),
        scratch_shapes=[pltpu.VMEM((KCa, Lt), compute_dtype)],
        compiler_params=pltpu.CompilerParams(
            dimension_semantics=("parallel", "arbitrary"),
            vmem_limit_bytes=vmem_limit),
    )(x_tiles, wq_aug, wkflat, sel, mask)

    # ---- fold attention into the value projection (tiny elementwise op) ----
    w2 = (att[:, :, :, None] * wv_aug[None, :, None, :]
          ).reshape(B, M, KCa).astype(compute_dtype)                    # (B, M, K*Ca)

    # ---- phase 2: one fused matmul per output tile, lane-dense (M, Lt) stores ----
    out_flat = pl.pallas_call(
        functools.partial(_sasa_apply_kernel, K=K, Ca=Ca, kw=kw, Wp=Wp, Lt=Lt),
        out_shape=jax.ShapeDtypeStruct((B, M, nT * Lt), f32),
        grid=(B, nT),
        in_specs=[
            pl.BlockSpec((None, None, Ca, Lh), lambda b, t: (b, t, 0, 0)),
            pl.BlockSpec((None, M, KCa), lambda b, t: (b, 0, 0)),
        ],
        out_specs=pl.BlockSpec((None, M, Lt), lambda b, t: (b, 0, t)),
        scratch_shapes=[pltpu.VMEM((KCa, Lt), compute_dtype)],
        compiler_params=pltpu.CompilerParams(
            dimension_semantics=("parallel", "parallel"),
            vmem_limit_bytes=vmem_limit),
    )(x_tiles, w2)

    # Epilogue: drop lane padding, wrap columns and padded rows (no transpose).
    out = out_flat.reshape(B, M, nT, Lt)[:, :, :, :Th * Wp]
    out = out.reshape(B, M, nT * Th, Wp)[:, :, :Ho, :Wo]
    return out.reshape(B, M, H // sh, W // sw)


# --------------------------------------------------------------------------
# Pure-JAX reference (mirrors the PyTorch forward exactly)
# --------------------------------------------------------------------------

def unfold_nchw(x, kh, kw, ph, pw, sh, sw):
    B, C, H, W = x.shape
    xp = jnp.pad(x, ((0, 0), (0, 0), (ph, ph), (pw, pw)))
    Ho = (H + 2 * ph - kh) // sh + 1
    Wo = (W + 2 * pw - kw) // sw + 1
    patches = []
    for i in range(kh):
        for j in range(kw):
            patches.append(
                xp[:, :, i:i + sh * (Ho - 1) + 1:sh, j:j + sw * (Wo - 1) + 1:sw])
    p = jnp.stack(patches, axis=2)
    return p.reshape(B, C, kh * kw, Ho * Wo), Ho, Wo


def sasa2d_ref(x, wq, wk, wv, row_table, col_table, row_idx, col_idx,
               kernel_size=(3, 3), padding=(1, 1), stride=(1, 1)):
    B, C, H, W = x.shape
    M = wq.shape[0]
    kh, kw = kernel_size
    K = kh * kw
    q_pos = math.ceil(K / 2)
    xu, _, _ = unfold_nchw(x, kh, kw, padding[0], padding[1], stride[0], stride[1])
    q = jnp.einsum('mc,bckl->bmkl', wq, xu)[:, :, q_pos, :][:, :, None, :]
    k = jnp.einsum('mc,bckl->bmkl', wk, xu)
    v = jnp.einsum('mc,bckl->bmkl', wv, xu)
    embT = jnp.concatenate([row_table[row_idx], col_table[col_idx]], axis=1).T
    logits = (jnp.einsum('bmik,bmjk->bmij', q, k)
              + q.sum(-1)[..., None] * embT[None, :, None, :])
    att = jax.nn.softmax(logits, axis=-1)
    out = (att[:, :, 0, :, None] * v).sum(2)
    return out.reshape(B, M, H // stride[0], W // stride[1])


# --------------------------------------------------------------------------
# Test
# --------------------------------------------------------------------------

if __name__ == "__main__":
    B, C, M, H, W = 2, 4, 8, 16, 16
    kh, kw = 3, 3

    key = jax.random.PRNGKey(0)
    k1, k2, k3, k4, k5, k6 = jax.random.split(key, 6)
    x = jax.random.normal(k1, (B, C, H, W), jnp.float32)
    scale = 1.0 / math.sqrt(C)
    wq = jax.random.normal(k2, (M, C), jnp.float32) * scale   # Conv2d 1x1 weights
    wk = jax.random.normal(k3, (M, C), jnp.float32) * scale
    wv = jax.random.normal(k4, (M, C), jnp.float32) * scale
    row_table = jax.random.normal(k5, (kh, M // 2), jnp.float32)
    col_table = jax.random.normal(k6, (kw, M // 2), jnp.float32)
    row_idx = jnp.array([0, 0, 0, 1, 1, 1, 2, 2, 2], jnp.int32)
    col_idx = jnp.array([0, 1, 2, 0, 1, 2, 0, 1, 2], jnp.int32)

    ref = sasa2d_ref(x, wq, wk, wv, row_table, col_table, row_idx, col_idx)

    # f32 path, forced multi-tile grid: exercises the halo + cross-tile logit accumulation.
    out32 = jax.block_until_ready(
        sasa2d_pallas(x, wq, wk, wv, row_table, col_table, row_idx, col_idx,
                      compute_dtype=jnp.float32, max_rows_per_tile=4))
    assert out32.shape == (B, M, H, W), out32.shape
    err32 = float(jnp.max(jnp.abs(out32 - ref)))
    rel32 = float(jnp.linalg.norm(out32 - ref) / jnp.linalg.norm(ref))
    assert err32 < 0.15 and rel32 < 3e-2, (err32, rel32)

    # Same f32 path without L-tiling: tight self-consistency check of the tiling logic.
    out32_full = jax.block_until_ready(
        sasa2d_pallas(x, wq, wk, wv, row_table, col_table, row_idx, col_idx,
                      compute_dtype=jnp.float32))
    tile_err = float(jnp.max(jnp.abs(out32 - out32_full)))
    assert tile_err < 1e-3, tile_err

    # bf16 path (deployment configuration), automatic tiling.
    outbf = jax.block_until_ready(
        sasa2d_pallas(x, wq, wk, wv, row_table, col_table, row_idx, col_idx,
                      compute_dtype=jnp.bfloat16))
    errbf = float(jnp.max(jnp.abs(outbf - ref)))
    relbf = float(jnp.linalg.norm(outbf - ref) / jnp.linalg.norm(ref))
    assert errbf < 0.25 and relbf < 5e-2, (errbf, relbf)

    print("KERNEL_OK")
</pallas_src>

<mosaic_0001>
module attributes {stable_mosaic.version = 11 : i64} {
  func.func @_sasa_logits_kernel(%arg0: i32, %arg1: i32, %arg2: memref<1x1x5x166xf32, #tpu.memory_space<vmem>>, %arg3: memref<8x5xf32, #tpu.memory_space<vmem>>, %arg4: memref<8x45xf32, #tpu.memory_space<vmem>>, %arg5: memref<45x9xf32, #tpu.memory_space<vmem>>, %arg6: memref<1x1x128xf32, #tpu.memory_space<vmem>>, %arg7: memref<1x8x9xf32, #tpu.memory_space<vmem>>, %arg8: memref<45x128xf32, #tpu.memory_space<vmem>>) attributes {dimension_semantics = [#tpu.dimension_semantics<parallel>, #tpu.dimension_semantics<arbitrary>], iteration_bounds = array<i64: 2, 4>, scalar_prefetch = 0 : i64, scratch_operands = 1 : i64, tpu.core_type = #tpu.core_type<tc>, window_params = [{transform_indices = @transform_0, window_bounds = array<i64: 1, 1, 5, 166>}, {pipeline_mode = #tpu.pipeline_mode<synchronous>, transform_indices = @transform_1, window_bounds = array<i64: 8, 5>}, {pipeline_mode = #tpu.pipeline_mode<synchronous>, transform_indices = @transform_2, window_bounds = array<i64: 8, 45>}, {pipeline_mode = #tpu.pipeline_mode<synchronous>, transform_indices = @transform_3, window_bounds = array<i64: 45, 9>}, {transform_indices = @transform_4, window_bounds = array<i64: 1, 1, 128>}, {transform_indices = @transform_5, window_bounds = array<i64: 1, 8, 9>}]} {
    %c0_i32 = arith.constant 0 : i32
    %0 = arith.cmpi eq, %arg1, %c0_i32 : i32
    %1 = arith.extui %0 : i1 to i32
    %c0_i32_0 = arith.constant 0 : i32
    %2 = arith.cmpi ne, %1, %c0_i32_0 : i32
    scf.if %2 {
      %cst_61 = arith.constant 0.000000e+00 : f32
      %52 = vector.broadcast %cst_61 : f32 to vector<8x9xf32>
      %c0_62 = arith.constant 0 : index
      %c0_63 = arith.constant 0 : index
      %c0_64 = arith.constant 0 : index
      %53 = vector.load %arg7[%c0_62, %c0_63, %c0_64] : memref<1x8x9xf32, #tpu.memory_space<vmem>>, vector<1x8x9xf32>
      %54 = vector.shape_cast %53 : vector<1x8x9xf32> to vector<8x9xf32>
      %55 = vector.shape_cast %52 : vector<8x9xf32> to vector<1x8x9xf32>
      tpu.vector_store %arg7[%c0_62, %c0_63, %c0_64], %55 {strides = array<i32>} : memref<1x8x9xf32, #tpu.memory_space<vmem>>, vector<1x8x9xf32>,
    } else {
    }
    %c0 = arith.constant 0 : index
    %c0_1 = arith.constant 0 : index
    %c0_2 = arith.constant 0 : index
    %c0_3 = arith.constant 0 : index
    %3 = vector.load %arg2[%c0, %c0_1, %c0_2, %c0_3] : memref<1x1x5x166xf32, #tpu.memory_space<vmem>>, vector<1x1x5x128xf32>
    %4 = vector.shape_cast %3 : vector<1x1x5x128xf32> to vector<5x128xf32>
    %c0_4 = arith.constant 0 : index
    %c0_5 = arith.constant 0 : index
    %5 = vector.load %arg8[%c0_4, %c0_5] : memref<45x128xf32, #tpu.memory_space<vmem>>, vector<5x128xf32>
    tpu.vector_store %arg8[%c0_4, %c0_5], %4 {strides = array<i32>} : memref<45x128xf32, #tpu.memory_space<vmem>>, vector<5x128xf32>,
    %c0_6 = arith.constant 0 : index
    %c0_7 = arith.constant 0 : index
    %c0_8 = arith.constant 0 : index
    %c1 = arith.constant 1 : index
    %6 = vector.load %arg2[%c0_6, %c0_7, %c0_8, %c1] : memref<1x1x5x166xf32, #tpu.memory_space<vmem>>, vector<1x1x5x128xf32>
    %7 = vector.shape_cast %6 : vector<1x1x5x128xf32> to vector<5x128xf32>
    %c5 = arith.constant 5 : index
    %c0_9 = arith.constant 0 : index
    %8 = vector.load %arg8[%c5, %c0_9] : memref<45x128xf32, #tpu.memory_space<vmem>>, vector<5x128xf32>
    tpu.vector_store %arg8[%c5, %c0_9], %7 {strides = array<i32>} : memref<45x128xf32, #tpu.memory_space<vmem>>, vector<5x128xf32>,
    %c0_10 = arith.constant 0 : index
    %c0_11 = arith.constant 0 : index
    %c0_12 = arith.constant 0 : index
    %c2 = arith.constant 2 : index
    %9 = vector.load %arg2[%c0_10, %c0_11, %c0_12, %c2] : memref<1x1x5x166xf32, #tpu.memory_space<vmem>>, vector<1x1x5x128xf32>
    %10 = vector.shape_cast %9 : vector<1x1x5x128xf32> to vector<5x128xf32>
    %c10 = arith.constant 10 : index
    %c0_13 = arith.constant 0 : index
    %11 = vector.load %arg8[%c10, %c0_13] : memref<45x128xf32, #tpu.memory_space<vmem>>, vector<5x128xf32>
    tpu.vector_store %arg8[%c10, %c0_13], %10 {strides = array<i32>} : memref<45x128xf32, #tpu.memory_space<vmem>>, vector<5x128xf32>,
    %c0_14 = arith.constant 0 : index
    %c0_15 = arith.constant 0 : index
    %c0_16 = arith.constant 0 : index
    %c18 = arith.constant 18 : index
    %12 = vector.load %arg2[%c0_14, %c0_15, %c0_16, %c18] : memref<1x1x5x166xf32, #tpu.memory_space<vmem>>, vector<1x1x5x128xf32>
    %13 = vector.shape_cast %12 : vector<1x1x5x128xf32> to vector<5x128xf32>
    %c15 = arith.constant 15 : index
    %c0_17 = arith.constant 0 : index
    %14 = vector.load %arg8[%c15, %c0_17] : memref<45x128xf32, #tpu.memory_space<vmem>>, vector<5x128xf32>
    tpu.vector_store %arg8[%c15, %c0_17], %13 {strides = array<i32>} : memref<45x128xf32, #tpu.memory_space<vmem>>, vector<5x128xf32>,
    %c0_18 = arith.constant 0 : index
    %c0_19 = arith.constant 0 : index
    %c0_20 = arith.constant 0 : index
    %c19 = arith.constant 19 : index
    %15 = vector.load %arg2[%c0_18, %c0_19, %c0_20, %c19] : memref<1x1x5x166xf32, #tpu.memory_space<vmem>>, vector<1x1x5x128xf32>
    %16 = vector.shape_cast %15 : vector<1x1x5x128xf32> to vector<5x128xf32>
    %c20 = arith.constant 20 : index
    %c0_21 = arith.constant 0 : index
    %17 = vector.load %arg8[%c20, %c0_21] : memref<45x128xf32, #tpu.memory_space<vmem>>, vector<5x128xf32>
    tpu.vector_store %arg8[%c20, %c0_21], %16 {strides = array<i32>} : memref<45x128xf32, #tpu.memory_space<vmem>>, vector<5x128xf32>,
    %c0_22 = arith.constant 0 : index
    %c0_23 = arith.constant 0 : index
    %c0_24 = arith.constant 0 : index
    %c20_25 = arith.constant 20 : index
    %18 = vector.load %arg2[%c0_22, %c0_23, %c0_24, %c20_25] : memref<1x1x5x166xf32, #tpu.memory_space<vmem>>, vector<1x1x5x128xf32>
    %19 = vector.shape_cast %18 : vector<1x1x5x128xf32> to vector<5x128xf32>
    %c25 = arith.constant 25 : index
    %c0_26 = arith.constant 0 : index
    %20 = vector.load %arg8[%c25, %c0_26] : memref<45x128xf32, #tpu.memory_space<vmem>>, vector<5x128xf32>
    tpu.vector_store %arg8[%c25, %c0_26], %19 {strides = array<i32>} : memref<45x128xf32, #tpu.memory_space<vmem>>, vector<5x128xf32>,
    %c0_27 = arith.constant 0 : index
    %c0_28 = arith.constant 0 : index
    %c0_29 = arith.constant 0 : index
    %c36 = arith.constant 36 : index
    %21 = vector.load %arg2[%c0_27, %c0_28, %c0_29, %c36] : memref<1x1x5x166xf32, #tpu.memory_space<vmem>>, vector<1x1x5x128xf32>
    %22 = vector.shape_cast %21 : vector<1x1x5x128xf32> to vector<5x128xf32>
    %c30 = arith.constant 30 : index
    %c0_30 = arith.constant 0 : index
    %23 = vector.load %arg8[%c30, %c0_30] : memref<45x128xf32, #tpu.memory_space<vmem>>, vector<5x128xf32>
    tpu.vector_store %arg8[%c30, %c0_30], %22 {strides = array<i32>} : memref<45x128xf32, #tpu.memory_space<vmem>>, vector<5x128xf32>,
    %c0_31 = arith.constant 0 : index
    %c0_32 = arith.constant 0 : index
    %c0_33 = arith.constant 0 : index
    %c37 = arith.constant 37 : index
    %24 = vector.load %arg2[%c0_31, %c0_32, %c0_33, %c37] : memref<1x1x5x166xf32, #tpu.memory_space<vmem>>, vector<1x1x5x128xf32>
    %25 = vector.shape_cast %24 : vector<1x1x5x128xf32> to vector<5x128xf32>
    %c35 = arith.constant 35 : index
    %c0_34 = arith.constant 0 : index
    %26 = vector.load %arg8[%c35, %c0_34] : memref<45x128xf32, #tpu.memory_space<vmem>>, vector<5x128xf32>
    tpu.vector_store %arg8[%c35, %c0_34], %25 {strides = array<i32>} : memref<45x128xf32, #tpu.memory_space<vmem>>, vector<5x128xf32>,
    %c0_35 = arith.constant 0 : index
    %c0_36 = arith.constant 0 : index
    %c0_37 = arith.constant 0 : index
    %c38 = arith.constant 38 : index
    %27 = vector.load %arg2[%c0_35, %c0_36, %c0_37, %c38] : memref<1x1x5x166xf32, #tpu.memory_space<vmem>>, vector<1x1x5x128xf32>
    %28 = vector.shape_cast %27 : vector<1x1x5x128xf32> to vector<5x128xf32>
    %c40 = arith.constant 40 : index
    %c0_38 = arith.constant 0 : index
    %29 = vector.load %arg8[%c40, %c0_38] : memref<45x128xf32, #tpu.memory_space<vmem>>, vector<5x128xf32>
    tpu.vector_store %arg8[%c40, %c0_38], %28 {strides = array<i32>} : memref<45x128xf32, #tpu.memory_space<vmem>>, vector<5x128xf32>,
    %c0_39 = arith.constant 0 : index
    %c0_40 = arith.constant 0 : index
    %30 = vector.load %arg3[%c0_39, %c0_40] : memref<8x5xf32, #tpu.memory_space<vmem>>, vector<8x5xf32>
    %c25_41 = arith.constant 25 : index
    %c0_42 = arith.constant 0 : index
    %31 = vector.load %arg8[%c25_41, %c0_42] : memref<45x128xf32, #tpu.memory_space<vmem>>, vector<5x128xf32>
    %cst = arith.constant dense<0.000000e+00> : vector<8x128xf32>
    %32 = tpu.matmul %30, %31, %cst {dimension_numbers = #tpu.dot_dimension_numbers<[1], [0], [0], [1], [0, 0, 1, 1], [], []>} : vector<8x5xf32>, vector<5x128xf32>, vector<8x128xf32> -> vector<8x128xf32>
    %c0_43 = arith.constant 0 : index
    %c0_44 = arith.constant 0 : index
    %c0_45 = arith.constant 0 : index
    %33 = vector.load %arg6[%c0_43, %c0_44, %c0_45] : memref<1x1x128xf32, #tpu.memory_space<vmem>>, vector<1x1x128xf32>
    %34 = vector.shape_cast %33 : vector<1x1x128xf32> to vector<1x128xf32>
    %35 = vector.broadcast %34 : vector<1x128xf32> to vector<8x128xf32>
    %36 = arith.mulf %32, %35 : vector<8x128xf32>
    %c0_46 = arith.constant 0 : index
    %c0_47 = arith.constant 0 : index
    %37 = vector.load %arg8[%c0_46, %c0_47] : memref<45x128xf32, #tpu.memory_space<vmem>>, vector<45x128xf32>
    %cst_48 = arith.constant dense<0.000000e+00> : vector<8x45xf32>
    %38 = tpu.matmul %36, %37, %cst_48 {dimension_numbers = #tpu.dot_dimension_numbers<[1], [1], [0], [0], [0, 0, 1, 0], [], []>} : vector<8x128xf32>, vector<45x128xf32>, vector<8x45xf32> -> vector<8x45xf32>
    %c0_49 = arith.constant 0 : index
    %c0_50 = arith.constant 0 : index
    %39 = vector.load %arg4[%c0_49, %c0_50] : memref<8x45xf32, #tpu.memory_space<vmem>>, vector<8x45xf32>
    %40 = arith.mulf %38, %39 : vector<8x45xf32>
    %c0_51 = arith.constant 0 : index
    %c0_52 = arith.constant 0 : index
    %c0_53 = arith.constant 0 : index
    %41 = vector.load %arg7[%c0_51, %c0_52, %c0_53] : memref<1x8x9xf32, #tpu.memory_space<vmem>>, vector<1x8x9xf32>
    %42 = vector.shape_cast %41 : vector<1x8x9xf32> to vector<8x9xf32>
    %c0_54 = arith.constant 0 : index
    %c0_55 = arith.constant 0 : index
    %43 = vector.load %arg5[%c0_54, %c0_55] : memref<45x9xf32, #tpu.memory_space<vmem>>, vector<45x9xf32>
    %cst_56 = arith.constant dense<0.000000e+00> : vector<8x9xf32>
    %44 = tpu.matmul %40, %43, %cst_56 {dimension_numbers = #tpu.dot_dimension_numbers<[1], [0], [0], [1], [0, 0, 1, 1], [], []>} : vector<8x45xf32>, vector<45x9xf32>, vector<8x9xf32> -> vector<8x9xf32>
    %45 = arith.addf %42, %44 : vector<8x9xf32>
    %c0_57 = arith.constant 0 : index
    %c0_58 = arith.constant 0 : index
    %c0_59 = arith.constant 0 : index
    %46 = vector.load %arg7[%c0_57, %c0_58, %c0_59] : memref<1x8x9xf32, #tpu.memory_space<vmem>>, vector<1x8x9xf32>
    %47 = vector.shape_cast %46 : vector<1x8x9xf32> to vector<8x9xf32>
    %48 = vector.shape_cast %45 : vector<8x9xf32> to vector<1x8x9xf32>
    tpu.vector_store %arg7[%c0_57, %c0_58, %c0_59], %48 {strides = array<i32>} : memref<1x8x9xf32, #tpu.memory_space<vmem>>, vector<1x8x9xf32>,
    %c3_i32 = arith.constant 3 : i32
    %49 = arith.cmpi eq, %arg1, %c3_i32 : i32
    %50 = arith.extui %49 : i1 to i32
    %c0_i32_60 = arith.constant 0 : i32
    %51 = arith.cmpi ne, %50, %c0_i32_60 : i32
    scf.if %51 {
      %c0_61 = arith.constant 0 : index
      %c0_62 = arith.constant 0 : index
      %c0_63 = arith.constant 0 : index
      %52 = vector.load %arg7[%c0_61, %c0_62, %c0_63] : memref<1x8x9xf32, #tpu.memory_space<vmem>>, vector<1x8x9xf32>
      %53 = vector.shape_cast %52 : vector<1x8x9xf32> to vector<8x9xf32>
      %cst_64 = arith.constant dense<0xFF800000> : vector<8xf32>
      %54 = vector.multi_reduction <maximumf>, %53, %cst_64 [1] : vector<8x9xf32> to vector<8xf32>
      %55 = vector.shape_cast %54 : vector<8xf32> to vector<8x1xf32>
      %56 = vector.broadcast %55 : vector<8x1xf32> to vector<8x9xf32>
      %57 = arith.subf %53, %56 : vector<8x9xf32>
      %58 = math.exp %57 : vector<8x9xf32>
      %cst_65 = arith.constant dense<0.000000e+00> : vector<8xf32>
      %59 = vector.multi_reduction <add>, %58, %cst_65 [1] : vector<8x9xf32> to vector<8xf32>
      %60 = vector.shape_cast %59 : vector<8xf32> to vector<8x1xf32>
      %61 = vector.broadcast %60 : vector<8x1xf32> to vector<8x9xf32>
      %62 = arith.divf %58, %61 : vector<8x9xf32>
      %c0_66 = arith.constant 0 : index
      %c0_67 = arith.constant 0 : index
      %c0_68 = arith.constant 0 : index
      %63 = vector.load %arg7[%c0_66, %c0_67, %c0_68] : memref<1x8x9xf32, #tpu.memory_space<vmem>>, vector<1x8x9xf32>
      %64 = vector.shape_cast %63 : vector<1x8x9xf32> to vector<8x9xf32>
      %65 = vector.shape_cast %62 : vector<8x9xf32> to vector<1x8x9xf32>
      tpu.vector_store %arg7[%c0_66, %c0_67, %c0_68], %65 {strides = array<i32>} : memref<1x8x9xf32, #tpu.memory_space<vmem>>, vector<1x8x9xf32>,
    } else {
    }
    return
  }
  func.func @transform_0(%arg0: i32, %arg1: i32) -> (i32, i32, i32, i32) {
    %c0_i32 = arith.constant 0 : i32
    %c0_i32_0 = arith.constant 0 : i32
    %c0_i32_1 = arith.constant 0 : i32
    return %arg0, %arg1, %c0_i32, %c0_i32_0 : i32, i32, i32, i32
  }
  func.func @transform_1(%arg0: i32, %arg1: i32) -> (i32, i32) {
    %c0_i32 = arith.constant 0 : i32
    %c0_i32_0 = arith.constant 0 : i32
    %c0_i32_1 = arith.constant 0 : i32
    return %c0_i32, %c0_i32_0 : i32, i32
  }
  func.func @transform_2(%arg0: i32, %arg1: i32) -> (i32, i32) {
    %c0_i32 = arith.constant 0 : i32
    %c0_i32_0 = arith.constant 0 : i32
    %c0_i32_1 = arith.constant 0 : i32
    return %c0_i32, %c0_i32_0 : i32, i32
  }
  func.func @transform_3(%arg0: i32, %arg1: i32) -> (i32, i32) {
    %c0_i32 = arith.constant 0 : i32
    %c0_i32_0 = arith.constant 0 : i32
    %c0_i32_1 = arith.constant 0 : i32
    return %c0_i32, %c0_i32_0 : i32, i32
  }
  func.func @transform_4(%arg0: i32, %arg1: i32) -> (i32, i32, i32) {
    %c0_i32 = arith.constant 0 : i32
    %c0_i32_0 = arith.constant 0 : i32
    %c0_i32_1 = arith.constant 0 : i32
    return %arg1, %c0_i32, %c0_i32_0 : i32, i32, i32
  }
  func.func @transform_5(%arg0: i32, %arg1: i32) -> (i32, i32, i32) {
    %c0_i32 = arith.constant 0 : i32
    %c0_i32_0 = arith.constant 0 : i32
    %c0_i32_1 = arith.constant 0 : i32
    return %arg0, %c0_i32, %c0_i32_0 : i32, i32, i32
  }
}

module attributes {stable_mosaic.version = 11 : i64} {
  func.func @_sasa_apply_kernel(%arg0: i32, %arg1: i32, %arg2: memref<1x1x5x166xf32, #tpu.memory_space<vmem>>, %arg3: memref<1x8x45xf32, #tpu.memory_space<vmem>>, %arg4: memref<1x8x128xf32, #tpu.memory_space<vmem>>, %arg5: memref<45x128xf32, #tpu.memory_space<vmem>>) attributes {dimension_semantics = [#tpu.dimension_semantics<parallel>, #tpu.dimension_semantics<parallel>], iteration_bounds = array<i64: 2, 4>, scalar_prefetch = 0 : i64, scratch_operands = 1 : i64, tpu.core_type = #tpu.core_type<tc>, window_params = [{transform_indices = @transform_0, window_bounds = array<i64: 1, 1, 5, 166>}, {transform_indices = @transform_1, window_bounds = array<i64: 1, 8, 45>}, {transform_indices = @transform_2, window_bounds = array<i64: 1, 8, 128>}]} {
    %c0 = arith.constant 0 : index
    %c0_0 = arith.constant 0 : index
    %c0_1 = arith.constant 0 : index
    %c0_2 = arith.constant 0 : index
    %0 = vector.load %arg2[%c0, %c0_0, %c0_1, %c0_2] : memref<1x1x5x166xf32, #tpu.memory_space<vmem>>, vector<1x1x5x128xf32>
    %1 = vector.shape_cast %0 : vector<1x1x5x128xf32> to vector<5x128xf32>
    %c0_3 = arith.constant 0 : index
    %c0_4 = arith.constant 0 : index
    %2 = vector.load %arg5[%c0_3, %c0_4] : memref<45x128xf32, #tpu.memory_space<vmem>>, vector<5x128xf32>
    tpu.vector_store %arg5[%c0_3, %c0_4], %1 {strides = array<i32>} : memref<45x128xf32, #tpu.memory_space<vmem>>, vector<5x128xf32>,
    %c0_5 = arith.constant 0 : index
    %c0_6 = arith.constant 0 : index
    %c0_7 = arith.constant 0 : index
    %c1 = arith.constant 1 : index
    %3 = vector.load %arg2[%c0_5, %c0_6, %c0_7, %c1] : memref<1x1x5x166xf32, #tpu.memory_space<vmem>>, vector<1x1x5x128xf32>
    %4 = vector.shape_cast %3 : vector<1x1x5x128xf32> to vector<5x128xf32>
    %c5 = arith.constant 5 : index
    %c0_8 = arith.constant 0 : index
    %5 = vector.load %arg5[%c5, %c0_8] : memref<45x128xf32, #tpu.memory_space<vmem>>, vector<5x128xf32>
    tpu.vector_store %arg5[%c5, %c0_8], %4 {strides = array<i32>} : memref<45x128xf32, #tpu.memory_space<vmem>>, vector<5x128xf32>,
    %c0_9 = arith.constant 0 : index
    %c0_10 = arith.constant 0 : index
    %c0_11 = arith.constant 0 : index
    %c2 = arith.constant 2 : index
    %6 = vector.load %arg2[%c0_9, %c0_10, %c0_11, %c2] : memref<1x1x5x166xf32, #tpu.memory_space<vmem>>, vector<1x1x5x128xf32>
    %7 = vector.shape_cast %6 : vector<1x1x5x128xf32> to vector<5x128xf32>
    %c10 = arith.constant 10 : index
    %c0_12 = arith.constant 0 : index
    %8 = vector.load %arg5[%c10, %c0_12] : memref<45x128xf32, #tpu.memory_space<vmem>>, vector<5x128xf32>
    tpu.vector_store %arg5[%c10, %c0_12], %7 {strides = array<i32>} : memref<45x128xf32, #tpu.memory_space<vmem>>, vector<5x128xf32>,
    %c0_13 = arith.constant 0 : index
    %c0_14 = arith.constant 0 : index
    %c0_15 = arith.constant 0 : index
    %c18 = arith.constant 18 : index
    %9 = vector.load %arg2[%c0_13, %c0_14, %c0_15, %c18] : memref<1x1x5x166xf32, #tpu.memory_space<vmem>>, vector<1x1x5x128xf32>
    %10 = vector.shape_cast %9 : vector<1x1x5x128xf32> to vector<5x128xf32>
    %c15 = arith.constant 15 : index
    %c0_16 = arith.constant 0 : index
    %11 = vector.load %arg5[%c15, %c0_16] : memref<45x128xf32, #tpu.memory_space<vmem>>, vector<5x128xf32>
    tpu.vector_store %arg5[%c15, %c0_16], %10 {strides = array<i32>} : memref<45x128xf32, #tpu.memory_space<vmem>>, vector<5x128xf32>,
    %c0_17 = arith.constant 0 : index
    %c0_18 = arith.constant 0 : index
    %c0_19 = arith.constant 0 : index
    %c19 = arith.constant 19 : index
    %12 = vector.load %arg2[%c0_17, %c0_18, %c0_19, %c19] : memref<1x1x5x166xf32, #tpu.memory_space<vmem>>, vector<1x1x5x128xf32>
    %13 = vector.shape_cast %12 : vector<1x1x5x128xf32> to vector<5x128xf32>
    %c20 = arith.constant 20 : index
    %c0_20 = arith.constant 0 : index
    %14 = vector.load %arg5[%c20, %c0_20] : memref<45x128xf32, #tpu.memory_space<vmem>>, vector<5x128xf32>
    tpu.vector_store %arg5[%c20, %c0_20], %13 {strides = array<i32>} : memref<45x128xf32, #tpu.memory_space<vmem>>, vector<5x128xf32>,
    %c0_21 = arith.constant 0 : index
    %c0_22 = arith.constant 0 : index
    %c0_23 = arith.constant 0 : index
    %c20_24 = arith.constant 20 : index
    %15 = vector.load %arg2[%c0_21, %c0_22, %c0_23, %c20_24] : memref<1x1x5x166xf32, #tpu.memory_space<vmem>>, vector<1x1x5x128xf32>
    %16 = vector.shape_cast %15 : vector<1x1x5x128xf32> to vector<5x128xf32>
    %c25 = arith.constant 25 : index
    %c0_25 = arith.constant 0 : index
    %17 = vector.load %arg5[%c25, %c0_25] : memref<45x128xf32, #tpu.memory_space<vmem>>, vector<5x128xf32>
    tpu.vector_store %arg5[%c25, %c0_25], %16 {strides = array<i32>} : memref<45x128xf32, #tpu.memory_space<vmem>>, vector<5x128xf32>,
    %c0_26 = arith.constant 0 : index
    %c0_27 = arith.constant 0 : index
    %c0_28 = arith.constant 0 : index
    %c36 = arith.constant 36 : index
    %18 = vector.load %arg2[%c0_26, %c0_27, %c0_28, %c36] : memref<1x1x5x166xf32, #tpu.memory_space<vmem>>, vector<1x1x5x128xf32>
    %19 = vector.shape_cast %18 : vector<1x1x5x128xf32> to vector<5x128xf32>
    %c30 = arith.constant 30 : index
    %c0_29 = arith.constant 0 : index
    %20 = vector.load %arg5[%c30, %c0_29] : memref<45x128xf32, #tpu.memory_space<vmem>>, vector<5x128xf32>
    tpu.vector_store %arg5[%c30, %c0_29], %19 {strides = array<i32>} : memref<45x128xf32, #tpu.memory_space<vmem>>, vector<5x128xf32>,
    %c0_30 = arith.constant 0 : index
    %c0_31 = arith.constant 0 : index
    %c0_32 = arith.constant 0 : index
    %c37 = arith.constant 37 : index
    %21 = vector.load %arg2[%c0_30, %c0_31, %c0_32, %c37] : memref<1x1x5x166xf32, #tpu.memory_space<vmem>>, vector<1x1x5x128xf32>
    %22 = vector.shape_cast %21 : vector<1x1x5x128xf32> to vector<5x128xf32>
    %c35 = arith.constant 35 : index
    %c0_33 = arith.constant 0 : index
    %23 = vector.load %arg5[%c35, %c0_33] : memref<45x128xf32, #tpu.memory_space<vmem>>, vector<5x128xf32>
    tpu.vector_store %arg5[%c35, %c0_33], %22 {strides = array<i32>} : memref<45x128xf32, #tpu.memory_space<vmem>>, vector<5x128xf32>,
    %c0_34 = arith.constant 0 : index
    %c0_35 = arith.constant 0 : index
    %c0_36 = arith.constant 0 : index
    %c38 = arith.constant 38 : index
    %24 = vector.load %arg2[%c0_34, %c0_35, %c0_36, %c38] : memref<1x1x5x166xf32, #tpu.memory_space<vmem>>, vector<1x1x5x128xf32>
    %25 = vector.shape_cast %24 : vector<1x1x5x128xf32> to vector<5x128xf32>
    %c40 = arith.constant 40 : index
    %c0_37 = arith.constant 0 : index
    %26 = vector.load %arg5[%c40, %c0_37] : memref<45x128xf32, #tpu.memory_space<vmem>>, vector<5x128xf32>
    tpu.vector_store %arg5[%c40, %c0_37], %25 {strides = array<i32>} : memref<45x128xf32, #tpu.memory_space<vmem>>, vector<5x128xf32>,
    %c0_38 = arith.constant 0 : index
    %c0_39 = arith.constant 0 : index
    %c0_40 = arith.constant 0 : index
    %27 = vector.load %arg3[%c0_38, %c0_39, %c0_40] : memref<1x8x45xf32, #tpu.memory_space<vmem>>, vector<1x8x45xf32>
    %28 = vector.shape_cast %27 : vector<1x8x45xf32> to vector<8x45xf32>
    %c0_41 = arith.constant 0 : index
    %c0_42 = arith.constant 0 : index
    %29 = vector.load %arg5[%c0_41, %c0_42] : memref<45x128xf32, #tpu.memory_space<vmem>>, vector<45x128xf32>
    %cst = arith.constant dense<0.000000e+00> : vector<8x128xf32>
    %30 = tpu.matmul %28, %29, %cst {dimension_numbers = #tpu.dot_dimension_numbers<[1], [0], [0], [1], [0, 0, 1, 1], [], []>} : vector<8x45xf32>, vector<45x128xf32>, vector<8x128xf32> -> vector<8x128xf32>
    %c0_43 = arith.constant 0 : index
    %c0_44 = arith.constant 0 : index
    %c0_45 = arith.constant 0 : index
    %31 = vector.load %arg4[%c0_43, %c0_44, %c0_45] : memref<1x8x128xf32, #tpu.memory_space<vmem>>, vector<1x8x128xf32>
    %32 = vector.shape_cast %31 : vector<1x8x128xf32> to vector<8x128xf32>
    %33 = vector.shape_cast %30 : vector<8x128xf32> to vector<1x8x128xf32>
    tpu.vector_store %arg4[%c0_43, %c0_44, %c0_45], %33 {strides = array<i32>} : memref<1x8x128xf32, #tpu.memory_space<vmem>>, vector<1x8x128xf32>,
    return
  }
  func.func @transform_0(%arg0: i32, %arg1: i32) -> (i32, i32, i32, i32) {
    %c0_i32 = arith.constant 0 : i32
    %c0_i32_0 = arith.constant 0 : i32
    %c0_i32_1 = arith.constant 0 : i32
    return %arg0, %arg1, %c0_i32, %c0_i32_0 : i32, i32, i32, i32
  }
  func.func @transform_1(%arg0: i32, %arg1: i32) -> (i32, i32, i32) {
    %c0_i32 = arith.constant 0 : i32
    %c0_i32_0 = arith.constant 0 : i32
    %c0_i32_1 = arith.constant 0 : i32
    return %arg0, %c0_i32, %c0_i32_0 : i32, i32, i32
  }
  func.func @transform_2(%arg0: i32, %arg1: i32) -> (i32, i32, i32) {
    %c0_i32 = arith.constant 0 : i32
    %c0_i32_0 = arith.constant 0 : i32
    return %arg0, %c0_i32, %arg1 : i32, i32, i32
  }
}

</mosaic_0001>

<bundles_post_ra>
// kernel: sasa2d_pallas.3
= control target key start
LH: loop header
LB: loop body
LE: loop exit
PB: predicated region body
PF: predicated region fallthrough
CT: control target
= control target key end

     0   :  { %s646_s9 = smov 0   ;;  %s648_s10 = smov 0   ;;  %s737_s0 = inlined_call_operand.vmem [shape: f32[2,4,5,166], index: 0, kind: input, shape index: {}]   ;;  %s738_s1 = inlined_call_operand.vmem [shape: f32[2,8,45], index: 1, kind: input, shape index: {}]   ;;  %s739_s2 = inlined_call_operand.vmem [shape: f32[2,8,512], index: 2, kind: output, shape index: {}]  }
   0x1   :  { %s650_s11 = smov 0   ;;  %s652_s12 = smov 0  }
   0x2   :  { %s654_s13 = smov 0  }
   0x3 LB: > { %s21_s14 = sadd.s32 1, %s609_s11  ;;  %s24_s15 = sadd.s32 1, %s613_s12  ;;  %s617_s13 = sphi %s654_s13, %s12_s13   ;;  %s613_s12 = sphi %s652_s12, %s743_s12   ;;  %s609_s11 = sphi %s650_s11, %s742_s11   ;;  %s605_s10 = sphi %s648_s10, %s741_s10   ;;  %s601_s9 = sphi %s646_s9, %s740_s9  }
   0x4   : > { %p22_p0 = scmp.ge.s32.totalorder %s21_s14, 4  ;;  %p484_p1 = scmp.ge.s32.totalorder %s617_s13, 1 }
   0x5   : > { %p141_p2 = scmp.lt.s32.totalorder %s617_s13, 9 }
   0x6   : > { %s745_s14 = smov (%p22_p0, %s21_s14), 0  ;;  %s747_s15 = smov (!%p22_p0, %s24_s15), %s613_s12 }
   0x7   : > { %p142_p3 = pnand %p484_p1, %p141_p2  ;;  %p26_p4 = scmp.ge.s32.totalorder %s747_s15, 2 }
   0x8   : > { %p174_p5 = scmp.lt.s32.totalorder (!%p142_p3), %s605_s10, 1  ;;  %p176_p6 = scmp.lt.s32.totalorder (!%p142_p3), %s601_s9, 3  ;;  %v621_v6 = vmov (!%p142_p3), 0.0|0.0   ;;  %vm627_vm0 = vmmov (!%p142_p3), 0   ;;  %v628_v18 = vmov (!%p142_p3), 0.0   ;;  %vm217_vm1 = vcmask (!%p142_p3), 1031168  }
   0x9   : > { %s749_s15 = smov (%p26_p4, %s747_s15), 0  ;;  %145 = sbr.rel (%p142_p3) target bundleno = 393 (0x189), region = 28 }
   0xa   : > { %s619_s23 = smov (!%p142_p3), 126   ;;  %s620_s24 = smov (!%p142_p3), 127   ;;  %517 = vmatprep.subr.bf16.mxu0 (!%p142_p3), %v621_v6  ;;  %514 = vmatprep.mubr.msk.f32.mxu0 (!%p142_p3), %vm627_vm0, %v628_v18  ;;  %vm205_vm2 = vcmask (!%p142_p3), 1039360   ;;  %vm229_vm3 = vcmask (!%p142_p3), 900096   ;;  %vm241_vm4 = vcmask (!%p142_p3), 891904   ;;  %vm253_vm5 = vcmask (!%p142_p3), 883712  }
   0xb   : > { %s622_s25 = smov (!%p142_p3), 110   ;;  %s623_s26 = smov (!%p142_p3), 109   ;;  %vm265_vm6 = vcmask (!%p142_p3), 752640   ;;  %vm277_vm7 = vcmask (!%p142_p3), 744448   ;;  %vm289_vm8 = vcmask (!%p142_p3), 736256   ;;  %vm304_vm9 = vcmask (!%p142_p3), 1044480  }
   0xc   : > { %s624_s27 = smov (!%p142_p3), 108   ;;  %s625_s28 = smov (!%p142_p3), 92   ;;  %vm630_vm10 = vmmov (!%p142_p3), 1   ;;  %vm300_vm12 = vcmask (!%p142_p3), 367616  }
   0xd   : > { %s626_s29 = smov (!%p142_p3), 91   ;;  %s629_s30 = smov (!%p142_p3), 90   ;;  %vm525_vm11 = vmpackc.low (!%p142_p3), %vm304_vm9, %vm630_vm10 }
  0x10   : > { %s751_s10 = smov (!%p174_p5, %s605_s10), 1  ;;  %s753_s9 = smov (!%p176_p6, %s601_s9), 3 }
  0x11   : > { %s486_s16 = sshll.u32 %s751_s10, 3  ;;  %s485_s17 = sshll.u32 %s753_s9, 1 }
  0x12   : > { %s180_s18 = sadd.s32 %s486_s16, %s485_s17  ;;  %s489_s3 = sshll.u32 %s751_s10, 2 }
  0x13   : > { %s487_s19 = sshll.u32 %s180_s18, 3  ;;  %s709_s4 = sadd.s32 %s489_s3, %s753_s9 }
  0x14   : > { %s687_s22 = scalar_lea.vmem %s737_s0, %s487_s19  ;;  %s186_s7 = scalar_lea.vmem %s738_s1, %s486_s16 }
  0x15   : > { %v209_v0 = vld [vmem:[%s687_s22] sm:$0x1f]  ;;  %v210_v2 = vld [vmem:[%s687_s22 + $0x8] sm:$0x1f]  ;;  %s490_s8 = sshll.u32 %s709_s4, 3 }
  0x16   : > { %v197_v1 = vld [vmem:[%s687_s22] sm:$0x1f]  ;;  %213 = vrot.lane.b32.xlu1 %v209_v0, %s619_s23  ;;  %v198_v3 = vld [vmem:[%s687_s22 + $0x8] sm:$0x1f]  ;;  %s194_s18 = scalar_lea.vmem %s739_s2, %s490_s8 }
  0x17   : > { %201 = vrot.lane.b32.xlu0 %v197_v1, %s620_s24  ;;  %v222_v4 = vld [vmem:[%s687_s22 + $0x8] sm:$0x1f]  ;;  %v221_v5 = vld [vmem:[%s687_s22] sm:$0x1f] }
  0x18   : > { %v195_v7 = vld [vmem:[%s687_s22] sm:$0x1f]  ;;  %v234_v8 = vld [vmem:[%s687_s22 + $0x8] sm:$0x1f] }
  0x19   : > { %196 = vst [vmem:[#allocation2] sm:$0x1f] %v195_v7  ;;  %v233_v9 = vld [vmem:[%s687_s22] sm:$0x1f]  ;;  %v246_v10 = vld [vmem:[%s687_s22 + $0x8] sm:$0x1f] }
  0x1a   : > { %215 = vrot.lane.b32.xlu1 %v210_v2, %s619_s23  ;;  %v245_v11 = vld [vmem:[%s687_s22] sm:$0x1f]  ;;  %v258_v12 = vld [vmem:[%s687_s22 + $0x8] sm:$0x1f] }
  0x1b   : > { %203 = vrot.lane.b32.xlu0 %v198_v3, %s620_s24  ;;  %v257_v13 = vld [vmem:[%s687_s22] sm:$0x1f]  ;;  %v270_v14 = vld [vmem:[%s687_s22 + $0x8] sm:$0x1f] }
  0x1c   : > { %v269_v15 = vld [vmem:[%s687_s22] sm:$0x1f]  ;;  %v282_v16 = vld [vmem:[%s687_s22 + $0x8] sm:$0x1f] }
  0x1d   : > { %v281_v17 = vld [vmem:[%s687_s22] sm:$0x1f] }
  0x1e   : > { %227 = vrot.lane.b32.xlu1 %v222_v4, %s622_s25  ;;  %v293_v52 = vld [vmem:[%s186_s7] sm:$0xff] }
  0x1f   : > { %225 = vrot.lane.b32.xlu0 %v221_v5, %s622_s25 }
  0x22   : > { %239 = vrot.lane.b32.xlu1 %v234_v8, %s623_s26 }
  0x23   : > { %237 = vrot.lane.b32.xlu0 %v233_v9, %s623_s26 }
  0x26   : > { %251 = vrot.lane.b32.xlu1 %v246_v10, %s624_s27 }
  0x27   : > { %249 = vrot.lane.b32.xlu0 %v245_v11, %s624_s27 }
  0x2a   : > { %263 = vrot.lane.b32.xlu1 %v258_v12, %s625_s28 }
  0x2b   : > { %261 = vrot.lane.b32.xlu0 %v257_v13, %s625_s28 }
  0x2e   : > { %275 = vrot.lane.b32.xlu1 %v270_v14, %s626_s29 }
  0x2f   : > { %273 = vrot.lane.b32.xlu0 %v269_v15, %s626_s29 }
  0x32   : > { %287 = vrot.lane.b32.xlu1 %v282_v16, %s629_s30 }
  0x33   : > { %285 = vrot.lane.b32.xlu0 %v281_v17, %s629_s30 }
  0x88   : > { %v214_v19 = vpop.permute.xlu1 %213 }
  0x89   : > { %v202_v20 = vpop.permute.xlu0 %201 }
  0x8c   : > { %v216_v21 = vpop.permute.xlu1 %215 }
  0x8d   : > { %v204_v22 = vpop.permute.xlu0 %203  ;;  %v218_v23 = vsel %vm217_vm1, %v214_v19, %v216_v21 }
  0x8e   : > { %v206_v24 = vsel %vm205_vm2, %v202_v20, %v204_v22  ;;  %220 = vst [vmem:[#allocation2 + $0xa] sm:$0x1f] %v218_v23 }
  0x8f   : > { %208 = vst [vmem:[#allocation2 + $0x5] sm:$0x1f] %v206_v24 }
  0x90   : > { %v228_v25 = vpop.permute.xlu1 %227 }
  0x91   : > { %v226_v26 = vpop.permute.xlu0 %225 }
  0x92   : > { %v230_v27 = vsel %vm229_vm3, %v226_v26, %v228_v25 }
  0x93   : > { %232 = vst [vmem:[#allocation2 + $0xf] sm:$0x1f] %v230_v27 }
  0x94   : > { %v240_v28 = vpop.permute.xlu1 %239 }
  0x95   : > { %v238_v29 = vpop.permute.xlu0 %237 }
  0x96   : > { %v242_v30 = vsel %vm241_vm4, %v238_v29, %v240_v28  ;;  %v294_v34 = vld [vmem:[#allocation2] sm:$0xff] }
  0x97   : > { %244 = vst [vmem:[#allocation2 + $0x14] sm:$0x1f] %v242_v30 }
  0x98   : > { %v252_v31 = vpop.permute.xlu1 %251 }
  0x99   : > { %v250_v32 = vpop.permute.xlu0 %249 }
  0x9a   : > { %v254_v33 = vsel %vm253_vm5, %v250_v32, %v252_v31  ;;  %v295_v35 = vld [vmem:[#allocation2 + $0x8] sm:$0xff] }
  0x9b   : > { %256 = vst [vmem:[#allocation2 + $0x19] sm:$0x1f] %v254_v33  ;;  %v518_v36 = vpack.c.bf16 %v295_v35, %v294_v34 }
  0x9c   : > { %v264_v37 = vpop.permute.xlu1 %263 }
  0x9d   : > { %v262_v38 = vpop.permute.xlu0 %261  ;;  %519 = vmatpush3.bf16.msra.mxu0 %v518_v36 }
  0x9e   : > { %v266_v39 = vsel %vm265_vm6, %v262_v38, %v264_v37  ;;  %520 = vmatprep.subr.bf16.mxu0 %v621_v6  ;;  %v296_v46 = vld [vmem:[#allocation2 + $0x10] sm:$0xff] }
  0x9f   : > { %268 = vst [vmem:[#allocation2 + $0x1e] sm:$0x1f] %v266_v39 }
  0xa0   : > { %v276_v40 = vpop.permute.xlu1 %275 }
  0xa1   : > { %v274_v41 = vpop.permute.xlu0 %273 }
  0xa2   : > { %v278_v42 = vsel %vm277_vm7, %v274_v41, %v276_v40 }
  0xa3   : > { %280 = vst [vmem:[#allocation2 + $0x23] sm:$0x1f] %v278_v42 }
  0xa4   : > { %v288_v43 = vpop.permute.xlu1 %287 }
  0xa5   : > { %v286_v44 = vpop.permute.xlu0 %285 }
  0xa6   : > { %v290_v45 = vsel %vm289_vm8, %v286_v44, %v288_v43  ;;  %v297_v47 = vld [vmem:[#allocation2 + $0x18] sm:$0xff] }
  0xa7   : > { %292 = vst [vmem:[#allocation2 + $0x28] sm:$0x1f] %v290_v45  ;;  %v521_v48 = vpack.c.bf16 %v297_v47, %v296_v46 }
  0xa9   : > { %522 = vmatpush3.bf16.msra.mxu0 %v521_v48 }
  0xaa   : > { %523 = vmatprep.subr.bf16.mxu0 %v621_v6  ;;  %v298_v49 = vld [vmem:[#allocation2 + $0x20] sm:$0xff] }
  0xae   : > { %v299_v50 = vld [vmem:[#allocation2 + $0x28] sm:$0x1f] }
  0xaf   : > { %v524_v51 = vpack.c.bf16 %v299_v50, %v298_v49 }
  0xb1   : > { %526 = vmatpush3.bf16.msk.msra.mxu0 %vm525_vm11, %v524_v51 }
  0xb4   : > { %515 = vmatmul.mubr.msk.f32.vlgmr.msra.gmra.mrb[0].mxu0 %vm300_vm12, %v293_v52 }
 0x187   : > { %v374_v53 = vpop.f32.mrb[0].mxu0 }
 0x188   : > { %378 = vst [vmem:[%s194_s18] sm:$0xff] %v374_v53  ;;  %v516_v54 = vpop.f32.mrb[1].mxu0 }
 0x189 PF: > { %s12_s13 = sadd.s32 1, %s617_s13   ;;  %s740_s9 = smov %s609_s11 }
 0x18a   : > { %p9_p7 = scmp.ge.s32.totalorder %s12_s13, 10   ;;  %s741_s10 = smov %s613_s12 }
 0x18b   : > { %s742_s11 = smov %s745_s14  ;;  %s743_s12 = smov %s749_s15 }
 0x18c   :  { %11 = sbr.rel (!%p9_p7) target bundleno = 3 (0x3), region = 61 }

// kernel: sasa2d_pallas.2
= control target key start
LH: loop header
LB: loop body
LE: loop exit
PB: predicated region body
PF: predicated region fallthrough
CT: control target
= control target key end

     0   :  { %s947_s18 = smov 0   ;;  %s949_s19 = smov 0   ;;  %s1085_s0 = inlined_call_operand.vmem [shape: f32[2,4,5,166], index: 0, kind: input, shape index: {}]   ;;  %s1086_s1 = inlined_call_operand.vmem [shape: f32[8,5], index: 1, kind: input, shape index: {}]   ;;  %s1087_s2 = inlined_call_operand.vmem [shape: f32[8,45], index: 2, kind: input, shape index: {}]   ;;  %s1088_s3 = inlined_call_operand.vmem [shape: f32[45,9], index: 3, kind: input, shape index: {}]   ;;  %s1089_s4 = inlined_call_operand.vmem [shape: f32[4,1,128], index: 4, kind: input, shape index: {}]   ;;  %s1090_s5 = inlined_call_operand.vmem [shape: f32[2,8,9], index: 5, kind: output, shape index: {}]  }
   0x1   :  { %s951_s20 = smov 0   ;;  %s953_s21 = smov 0  }
   0x2   :  { %s955_s22 = smov 0  }
   0x3 LB: > { %s24_s23 = sadd.s32 1, %s894_s20  ;;  %s27_s24 = sadd.s32 1, %s898_s21  ;;  %s902_s22 = sphi %s955_s22, %s15_s22   ;;  %s898_s21 = sphi %s953_s21, %s1094_s21   ;;  %s894_s20 = sphi %s951_s20, %s1093_s20   ;;  %s890_s19 = sphi %s949_s19, %s1092_s19   ;;  %s886_s18 = sphi %s947_s18, %s1091_s18  }
   0x4   : > { %p25_p0 = scmp.ge.s32.totalorder %s24_s23, 4  ;;  %p723_p1 = scmp.ge.s32.totalorder %s902_s22, 1 }
   0x5   : > { %p213_p2 = scmp.lt.s32.totalorder %s902_s22, 9 }
   0x6   : > { %s1096_s23 = smov (%p25_p0, %s24_s23), 0  ;;  %s1098_s24 = smov (!%p25_p0, %s27_s24), %s898_s21 }
   0x7   : > { %p214_p3 = pnand %p723_p1, %p213_p2  ;;  %p29_p4 = scmp.ge.s32.totalorder %s1098_s24, 2 }
   0x8   : > { %p247_p5 = scmp.lt.s32.totalorder (!%p214_p3), %s890_s19, 1  ;;  %p249_p6 = scmp.lt.s32.totalorder (!%p214_p3), %s886_s18, 3 }
   0x9   : > { %s1100_s24 = smov (%p29_p4, %s1098_s24), 0  ;;  %217 = sbr.rel (%p214_p3) target bundleno = 1118 (0x45e), region = 40 }
   0xa   : > { %p728_p7 = scmp.ne.s32.totalorder (!%p214_p3), %s886_s18, 0 }
  0x10   : > { %s1102_s19 = smov (!%p247_p5, %s890_s19), 1  ;;  %266 = sbr.rel (%p728_p7) target bundleno = 23 (0x17), region = 44 }
  0x11   : > { %s981_s25 = scalar_select %p249_p6, %s886_s18, 3 }
  0x12   : > { %s725_s26 = sshll.u32 %s1102_s19, 3  ;;  %vm267_vm0 = vcmask (!%p728_p7), 72704   ;;  %v904_v0 = vmov (!%p728_p7), 0.0  }
  0x13   : > { %s724_s27 = sshll.u32 %s981_s25, 1  ;;  %s258_s30 = scalar_lea.vmem %s1089_s4, %s981_s25 }
  0x14   : > { %s253_s6 = sadd.s32 %s725_s26, %s724_s27  ;;  %s991_s9 = scalar_lea.vmem %s1090_s5, %s725_s26 }
  0x15   : > { %s726_s10 = sshll.u32 %s253_s6, 3  ;;  %268 = vst.msk [vmem:[%s991_s9] sm:$0xff] (!%p728_p7), %vm267_vm0, %v904_v0 }
  0x16   : > { %s996_s13 = scalar_lea.vmem %s1085_s0, %s726_s10 }
  0x17 PF: > { %v319_v1 = vld [vmem:[%s996_s13] sm:$0x1f]  ;;  %s905_s14 = smov 108   ;;  %s906_s15 = smov 127   ;;  %v320_v3 = vld [vmem:[%s996_s13 + $0x8] sm:$0x1f] }
  0x18   : > { %v271_v2 = vld [vmem:[%s996_s13] sm:$0x1f]  ;;  %323 = vrot.lane.b32.xlu0 %v319_v1, %s905_s14  ;;  %v272_v4 = vld [vmem:[%s996_s13 + $0x8] sm:$0x1f]  ;;  %v907_v8 = vmov 0.0   ;;  %vm908_vm1 = vmmov 0  }
  0x19   : > { %275 = vrot.lane.b32.xlu1 %v271_v2, %s906_s15  ;;  %v283_v5 = vld [vmem:[%s996_s13] sm:$0x1f]  ;;  %v284_v6 = vld [vmem:[%s996_s13 + $0x8] sm:$0x1f]  ;;  %753 = vmatprep.subr.mxu0 %v907_v8  ;;  %s909_s16 = smov 126   ;;  %v910_v11 = vmov 0.0|0.0  }
  0x1a   : > { %v269_v7 = vld [vmem:[%s996_s13] sm:$0x1f]  ;;  %755 = vmatprep.mubr.msk.f32.mxu0 %vm908_vm1, %v907_v8  ;;  %770 = vmatprep.mubr.msk.f32.mxu1 %vm908_vm1, %v907_v8  ;;  %v296_v10 = vld [vmem:[%s996_s13 + $0x8] sm:$0x1f]  ;;  %s911_s17 = smov 110   ;;  %s912_s19 = smov 109  }
  0x1b   : > { %270 = vst [vmem:[#allocation2] sm:$0x1f] %v269_v7  ;;  %v295_v9 = vld [vmem:[%s996_s13] sm:$0x1f]  ;;  %788 = vmatprep.subr.bf16.mxu1 %v910_v11  ;;  %v308_v13 = vld [vmem:[%s996_s13 + $0x8] sm:$0x1f] }
  0x1c   : > { %325 = vrot.lane.b32.xlu0 %v320_v3, %s905_s14  ;;  %v307_v12 = vld [vmem:[%s996_s13] sm:$0x1f]  ;;  %v332_v15 = vld [vmem:[%s996_s13 + $0x8] sm:$0x1f]  ;;  %s913_s26 = smov 92   ;;  %s914_s27 = smov 91  }
  0x1d   : > { %277 = vrot.lane.b32.xlu1 %v272_v4, %s906_s15  ;;  %v331_v14 = vld [vmem:[%s996_s13] sm:$0x1f]  ;;  %v344_v17 = vld [vmem:[%s996_s13 + $0x8] sm:$0x1f]  ;;  %s915_s28 = smov 90   ;;  %vm327_vm2 = vcmask 883712  }
  0x1e   : > { %v343_v16 = vld [vmem:[%s996_s13] sm:$0x1f]  ;;  %v356_v19 = vld [vmem:[%s996_s13 + $0x8] sm:$0x1f]  ;;  %vm279_vm3 = vcmask 1039360   ;;  %vm291_vm4 = vcmask 1031168  }
  0x1f   : > { %v355_v18 = vld [vmem:[%s996_s13] sm:$0x1f]  ;;  %vm303_vm5 = vcmask 900096   ;;  %vm373_vm6 = vcmask 1044480   ;;  %vm369_vm7 = vcmask 39936   ;;  %vm315_vm8 = vcmask 891904  }
  0x20   : > { %287 = vrot.lane.b32.xlu0 %v283_v5, %s909_s16  ;;  %v367_v31 = vld [vmem:[%s1086_s1] sm:$0xff]  ;;  %vm339_vm9 = vcmask 752640   ;;  %vm351_vm10 = vcmask 744448   ;;  %vm363_vm11 = vcmask 736256   ;;  %v535_v56 = vld [vmem:[%s1088_s3 + $0x8] sm:$0xff]  ;;  %v536_v57 = vld [vmem:[%s1088_s3 + $0x10] sm:$0xff] }
  0x21   : > { %289 = vrot.lane.b32.xlu1 %v284_v6, %s909_s16  ;;  %v534_v55 = vld [vmem:[%s1088_s3] sm:$0xff]  ;;  %v537_v59 = vld [vmem:[%s1088_s3 + $0x18] sm:$0xff]  ;;  %vm916_vm12 = vmmov 1   ;;  %v539_v2 = vld [vmem:[%s1088_s3 + $0x28] sm:$0x1f]  ;;  %vm540_vm14 = vcmask 367616  }
  0x22   : > { %v798_v58 = vpack.c.bf16 %v535_v56, %v534_v55  ;;  %v801_v60 = vpack.c.bf16 %v537_v59, %v536_v57  ;;  %v731_v61 = vld [vmem:[%s258_s30] ss:$0 sm:$0xff]  ;;  %vm805_vm13 = vmpackc.low %vm373_vm6, %vm916_vm12  ;;  %vm618_vm15 = vcmask 72704   ;;  %p734_p8 = scmp.ne.s32.totalorder %s886_s18, 3 }
  0x23   : > { %v538_v1 = vld [vmem:[%s1088_s3 + $0x20] sm:$0xff] }
  0x24   : > { %299 = vrot.lane.b32.xlu0 %v295_v9, %s911_s17  ;;  %v804_v3 = vpack.c.bf16 %v539_v2, %v538_v1  ;;  %v531_v4 = vld [vmem:[%s1087_s2] sm:$0xff] }
  0x25   : > { %301 = vrot.lane.b32.xlu1 %v296_v10, %s911_s17 }
  0x28   : > { %311 = vrot.lane.b32.xlu0 %v307_v12, %s912_s19 }
  0x29   : > { %313 = vrot.lane.b32.xlu1 %v308_v13, %s912_s19 }
  0x2c   : > { %335 = vrot.lane.b32.xlu0 %v331_v14, %s913_s26 }
  0x2d   : > { %337 = vrot.lane.b32.xlu1 %v332_v15, %s913_s26 }
  0x30   : > { %347 = vrot.lane.b32.xlu0 %v343_v16, %s914_s27 }
  0x31   : > { %349 = vrot.lane.b32.xlu1 %v344_v17, %s914_s27 }
  0x34   : > { %359 = vrot.lane.b32.xlu0 %v355_v18, %s915_s28 }
  0x35   : > { %361 = vrot.lane.b32.xlu1 %v356_v19, %s915_s28 }
  0x8a   : > { %v324_v20 = vpop.permute.xlu0 %323 }
  0x8b   : > { %v276_v21 = vpop.permute.xlu1 %275 }
  0x8e   : > { %v326_v22 = vpop.permute.xlu0 %325 }
  0x8f   : > { %v278_v23 = vpop.permute.xlu1 %277  ;;  %v328_v24 = vsel %vm327_vm2, %v324_v20, %v326_v22 }
  0x90   : > { %v280_v25 = vsel %vm279_vm3, %v276_v21, %v278_v23  ;;  %330 = vst [vmem:[#allocation2 + $0x19] sm:$0x1f] %v328_v24 }
  0x91   : > { %282 = vst [vmem:[#allocation2 + $0x5] sm:$0x1f] %v280_v25 }
  0x92   : > { %v288_v26 = vpop.permute.xlu0 %287 }
  0x93   : > { %v290_v27 = vpop.permute.xlu1 %289 }
  0x94   : > { %v292_v28 = vsel %vm291_vm4, %v288_v26, %v290_v27 }
  0x95   : > { %294 = vst [vmem:[#allocation2 + $0xa] sm:$0x1f] %v292_v28 }
  0x96   : > { %v300_v29 = vpop.permute.xlu0 %299 }
  0x97   : > { %v302_v30 = vpop.permute.xlu1 %301  ;;  %v368_v33 = vld [vmem:[#allocation2 + $0x19] sm:$0x1f] }
  0x98   : > { %v304_v32 = vsel %vm303_vm5, %v300_v29, %v302_v30  ;;  %754 = vmatpush3.msk.msra.mxu0 %vm373_vm6, %v368_v33  ;;  %v455_v37 = vld [vmem:[#allocation2] sm:$0xff] }
  0x99   : > { %306 = vst [vmem:[#allocation2 + $0xf] sm:$0x1f] %v304_v32  ;;  %756 = vmatmul.mubr.msk.f32.vlgmr.msra.gmra.mrb[0].mxu0 %vm369_vm7, %v367_v31  ;;  %797 = vmatprep.subr.bf16.mxu0 %v910_v11 }
  0x9a   : > { %v312_v34 = vpop.permute.xlu0 %311  ;;  %785 = vmatprep.mubr.msk.f32.mxu0 %vm908_vm1, %v907_v8  ;;  %799 = vmatpush3.bf16.msra.mxu0 %v798_v58  ;;  %v533_v8 = vld [vmem:[%s991_s9] sm:$0xff] }
  0x9b   : > { %v314_v35 = vpop.permute.xlu1 %313  ;;  %800 = vmatprep.subr.bf16.mxu0 %v910_v11 }
  0x9c   : > { %v316_v36 = vsel %vm315_vm8, %v312_v34, %v314_v35 }
  0x9d   : > { %318 = vst [vmem:[#allocation2 + $0x14] sm:$0x1f] %v316_v36 }
  0x9e   : > { %v336_v38 = vpop.permute.xlu0 %335  ;;  %802 = vmatpush3.bf16.msra.mxu0 %v801_v60 }
  0x9f   : > { %v338_v39 = vpop.permute.xlu1 %337  ;;  %803 = vmatprep.subr.bf16.mxu0 %v910_v11 }
  0xa0   : > { %v340_v40 = vsel %vm339_vm9, %v336_v38, %v338_v39  ;;  %v456_v41 = vld [vmem:[#allocation2 + $0x8] sm:$0xff] }
  0xa1   : > { %342 = vst [vmem:[#allocation2 + $0x1e] sm:$0x1f] %v340_v40  ;;  %v789_v42 = vpack.c.bf16 %v456_v41, %v455_v37 }
  0xa2   : > { %v348_v43 = vpop.permute.xlu0 %347  ;;  %806 = vmatpush3.bf16.msk.msra.mxu0 %vm805_vm13, %v804_v3 }
  0xa3   : > { %790 = vmatpush3.bf16.xpose.msra.mxu1 %v789_v42  ;;  %v350_v44 = vpop.permute.xlu1 %349 }
  0xa4   : > { %791 = vmatprep.subr.bf16.mxu1 %v910_v11  ;;  %v352_v45 = vsel %vm351_vm10, %v348_v43, %v350_v44  ;;  %v457_v46 = vld [vmem:[#allocation2 + $0x10] sm:$0xff] }
  0xa5   : > { %354 = vst [vmem:[#allocation2 + $0x23] sm:$0x1f] %v352_v45 }
  0xa6   : > { %v360_v47 = vpop.permute.xlu0 %359 }
  0xa7   : > { %v362_v48 = vpop.permute.xlu1 %361 }
  0xa8   : > { %v458_v49 = vld [vmem:[#allocation2 + $0x18] sm:$0xff]  ;;  %v364_v50 = vsel %vm363_vm11, %v360_v47, %v362_v48 }
  0xa9   : > { %v792_v51 = vpack.c.bf16 %v458_v49, %v457_v46  ;;  %366 = vst [vmem:[#allocation2 + $0x28] sm:$0x1f] %v364_v50 }
  0xab   : > { %793 = vmatpush3.bf16.xpose.msra.mxu1 %v792_v51 }
  0xac   : > { %794 = vmatprep.subr.bf16.mxu1 %v910_v11  ;;  %v459_v52 = vld [vmem:[#allocation2 + $0x20] sm:$0xff] }
  0xb0   : > { %v460_v53 = vld [vmem:[#allocation2 + $0x28] sm:$0x1f] }
  0xb1   : > { %v795_v54 = vpack.c.bf16 %v460_v53, %v459_v52 }
  0xb3   : > { %796 = vmatpush3.bf16.xpose.msra.mxu1 %v795_v54 }
 0x16c   : > { %v443_v62 = vpop.f32.mrb[0].mxu0 }
 0x16d   : > { %v454_v63 = vmul.f32 %v731_v61, %v443_v62  ;;  %v757_v0 = vpop.f32.mrb[1].mxu0 }
 0x16f   : > { %771 = vmatmul.mubr.f32.vlgmr.msra.gmra.mrb[0].mxu1 %v454_v63 }
 0x242   : > { %v527_v5 = vpop.f32.mrb[0].mxu1 }
 0x243   : > { %v532_v6 = vmul.f32 %v531_v4, %v527_v5  ;;  %v772_v7 = vpop.f32.mrb[1].mxu1 }
 0x245   : > { %786 = vmatmul.mubr.msk.f32.vlgmr.msra.gmra.mrb[2].mxu0 %vm540_vm14, %v532_v6 }
 0x315   : > { %623 = sbr.rel (%p734_p8) target bundleno = 1118 (0x45e), region = 48 }
 0x318   : > { %v613_v9 = vpop.f32.mrb[2].mxu0 }
 0x319   : > { %v617_v10 = vadd.f32 %v613_v9, %v533_v8  ;;  %v787_v11 = vpop.f32.mrb[3].mxu0 }
 0x31b   : > { %619 = vst.msk [vmem:[%s991_s9] sm:$0xff] %vm618_vm15, %v617_v10 }
 0x322   : > { %v624_v12 = vld [vmem:[%s991_s9] sm:$0xff] }
 0x323   : > { %v625_v13 = vsel %vm618_vm15, %v624_v12, -inf }
 0x324   : > { %626 = vmax.xlane.f32.xlu0 %v625_v13 }
 0x3b1   : > { %v627_v14 = vpop.xlane.xlu0 %626 }
 0x3b2   : > { %v628_v15 = vsub.f32 %v624_v12, %v627_v14 }
 0x3b4   : > { %v629_v16 = vmul.f32 1.442695, %v628_v15 }
 0x3b6   : > { %860 = vpow2.f32 %v629_v16 }
 0x3c0   : > { %v861_v17 = vpop.eup %860 }
 0x3c1   : > { %v631_v18 = vsel %vm618_vm15, %v861_v17, 0.0 }
 0x3c2   : > { %632 = vadd.xlane.f32.xlu0 %v631_v18 }
 0x44f   : > { %v633_v19 = vpop.xlane.xlu0 %632 }
 0x450   : > { %862 = vrcp.f32 %v633_v19 }
 0x45a   : > { %v863_v20 = vpop.eup %862 }
 0x45b   : > { %v635_v21 = vmul.f32 %v863_v20, %v861_v17 }
 0x45d   : > { %636 = vst.msk [vmem:[%s991_s9] sm:$0xff] %vm618_vm15, %v635_v21 }
 0x45e PF: > { %s15_s22 = sadd.s32 1, %s902_s22   ;;  %s1091_s18 = smov %s894_s20 }
 0x45f   : > { %p12_p9 = scmp.ge.s32.totalorder %s15_s22, 10   ;;  %s1092_s19 = smov %s898_s21 }
 0x460   : > { %s1093_s20 = smov %s1096_s23  ;;  %s1094_s21 = smov %s1100_s24 }
 0x461   :  { %14 = sbr.rel (!%p12_p9) target bundleno = 3 (0x3), region = 81 }

</bundles_post_ra>
